<compile_context>
chip_gen: v7x
topology: tpu7x:2x2x1
jax: 0.10.0
libtpu: 0.0.40
codegen_flags: <defaults>
</compile_context>

<pallas_src>
import functools

import jax
import jax.numpy as jnp
from jax.experimental import pallas as pl
from jax.experimental.pallas import tpu as pltpu


# Tile-size caps (multiples of (8, 128); clamped to the padded problem size).
_TN_MAX = 512    # node-tile rows (f32 acc = TN*Dp*4 B, well under scoped VMEM)
_TE_MAX = 512    # edge-tile (matmul K) length


def _round_up(x, m):
    return ((x + m - 1) // m) * m


def _segment_sum_kernel(counts_ref, fetch_ref, idx_ref, edges_ref, out_ref,
                        acc_ref, *, k_slice, precision):
    # counts_ref: (grid_n*grid_e,) int32 SMEM -- #edges landing in this (n,e) pair
    # fetch_ref:  (grid_n*grid_e,) int32 SMEM -- edge-tile block fetched this step
    # idx_ref:    (1, TE)   int32   -- receiver (or sender) node id per edge
    # edges_ref:  (TE, Dp)  float   -- edge-feature tile
    # out_ref:    (TN, Dp)  float   -- aggregated node-feature tile
    # acc_ref:    (TN, Dp)  float32 -- accumulator (resident across edge tiles)
    n_idx = pl.program_id(0)
    e_idx = pl.program_id(1)
    num_e = pl.num_programs(1)

    tn = acc_ref.shape[0]
    te = edges_ref.shape[0]
    num_slices = te // k_slice

    @pl.when(e_idx == 0)
    def _init():
        acc_ref[...] = jnp.zeros_like(acc_ref)

    step = n_idx * num_e + e_idx

    @pl.when(counts_ref[step] > 0)
    def _accumulate():
        # Loop-invariant tile-local row ids; subtract the node-tile base from
        # the (1, k_slice) index row instead of adding it to the (tn, k_slice)
        # iota -> saves tn*k_slice int adds per slice.
        row_ids = jax.lax.broadcasted_iota(jnp.int32, (tn, k_slice), 0)
        base = n_idx * tn

        def slice_dot(k):
            start = pl.multiple_of(k * k_slice, k_slice)
            idx_local = idx_ref[:, pl.ds(start, k_slice)] - base       # (1, ks)
            # One-hot scatter matrix in the edges dtype (exact for 0/1 values).
            onehot = (row_ids == idx_local).astype(edges_ref.dtype)    # (tn, ks)
            return jnp.dot(onehot, edges_ref[pl.ds(start, k_slice), :],
                           preferred_element_type=jnp.float32,
                           precision=precision)

        acc_ref[...] += slice_dot(0)
        if num_slices > 1:
            def body(k, carry):
                acc_ref[...] += slice_dot(k)
                return carry
            jax.lax.fori_loop(1, num_slices, body, 0, unroll=True)

    @pl.when(e_idx == num_e - 1)
    def _finalize():
        out_ref[...] = acc_ref[...].astype(out_ref.dtype)


def edges_to_nodes_aggregate(edges, senders, receivers, num_nodes,
                             use_sent_edges=False):
    """Pallas equivalent of _EdgesToNodesAggregator.forward (segment-sum reducer)."""
    indices = senders if use_sent_edges else receivers
    num_edges, edge_dim = edges.shape
    dtype = edges.dtype

    if num_edges == 0 or num_nodes == 0:
        return jnp.zeros((num_nodes, edge_dim), dtype=dtype)

    # ---- padded, lane-dense problem sizes --------------------------------
    d_pad = _round_up(edge_dim, 128)                  # lane-dense feature dim
    # Keep double-buffered tiles inside the default scoped-VMEM budget on all
    # generations when features are very wide.
    te_cap = _TE_MAX if d_pad <= 512 else 256
    tn_cap = _TN_MAX if d_pad <= 512 else 256
    te = min(te_cap, _round_up(num_edges, 128))       # edge tile (mult. of 128)
    e_pad = _round_up(num_edges, te)
    tn = min(tn_cap, _round_up(num_nodes, 8))         # node tile (mult. of 8)
    n_pad = _round_up(_round_up(num_nodes, 8), tn)
    k_slice = 256 if te % 256 == 0 else 128           # in-kernel K sub-slice

    grid_n = n_pad // tn
    grid_e = e_pad // te

    # ---- pad only when needed (no extra HBM pass in the aligned case) ----
    if (e_pad, d_pad) != (num_edges, edge_dim):
        edges_p = jnp.pad(edges, ((0, e_pad - num_edges), (0, d_pad - edge_dim)))
    else:
        edges_p = edges
    idx = indices.astype(jnp.int32)
    if e_pad != num_edges:
        # Sentinel -1 never matches any node row -> padded edges are dropped,
        # matching unsorted_segment_sum out-of-range semantics.  Indices in
        # [num_nodes, n_pad) land in padded output rows which are sliced off.
        idx = jnp.pad(idx, (0, e_pad - num_edges), constant_values=-1)
    idx_p = idx.reshape(1, e_pad)

    # ---- block-sparse occupancy + fetch tables (scalar prefetch) ---------
    # counts[n*grid_e + e] = #edges of edge-tile e whose index lies in node-tile n.
    bins = jnp.where(idx >= 0, idx // tn, grid_n)          # grid_n = overflow bin
    bins = jnp.clip(bins, 0, grid_n)
    tile_e = jnp.arange(e_pad, dtype=jnp.int32) // te
    counts = (jnp.zeros(((grid_n + 1) * grid_e,), jnp.int32)
              .at[bins * grid_e + tile_e].add(1))[: grid_n * grid_e]
    # fetch[step] = edge-tile block to have resident at this grid step: the
    # last non-empty edge tile at or before `step` in grid order (fill-forward
    # via cummax).  For empty tiles the index_map repeats the previous block,
    # so the pipeline issues no DMA.
    steps = jnp.arange(grid_n * grid_e, dtype=jnp.int32)
    last_nz = jax.lax.cummax(jnp.where(counts > 0, steps, -1), axis=0)
    fetch = (jnp.maximum(last_nz, 0) % grid_e).astype(jnp.int32)
    # TODO(synk): for very large grids the 1D SMEM tables pad to the next
    # power of two; chunk the node grid if grid_n*grid_e outgrows SMEM.

    # Full-f32 MXU path for f32 edges (one-hot is exact in any dtype).
    precision = jax.lax.Precision.HIGHEST if dtype == jnp.float32 else None

    bytes_per = jnp.dtype(dtype).itemsize
    cost = pl.CostEstimate(
        flops=2 * n_pad * e_pad * d_pad,
        transcendentals=0,
        # edges + indices are re-streamed once per node tile.
        bytes_accessed=(grid_n * (e_pad * d_pad * bytes_per + e_pad * 4)
                        + n_pad * d_pad * bytes_per),
    )

    kernel = functools.partial(_segment_sum_kernel,
                               k_slice=k_slice, precision=precision)

    out_p = pl.pallas_call(
        kernel,
        out_shape=jax.ShapeDtypeStruct((n_pad, d_pad), dtype),
        grid_spec=pltpu.PrefetchScalarGridSpec(
            num_scalar_prefetch=2,
            grid=(grid_n, grid_e),
            in_specs=[
                pl.BlockSpec((1, te),
                             lambda n, e, counts, fetch: (0, fetch[n * grid_e + e])),
                pl.BlockSpec((te, d_pad),
                             lambda n, e, counts, fetch: (fetch[n * grid_e + e], 0)),
            ],
            out_specs=pl.BlockSpec((tn, d_pad),
                                   lambda n, e, counts, fetch: (n, 0)),
            scratch_shapes=[pltpu.VMEM((tn, d_pad), jnp.float32)],
        ),
        compiler_params=pltpu.CompilerParams(
            dimension_semantics=("parallel", "arbitrary")),
        cost_estimate=cost,
    )(counts, fetch, idx_p, edges_p)

    return out_p[:num_nodes, :edge_dim]


class EdgesToNodesAggregator:
    """Mirror of the PyTorch module's constructor / forward contract."""

    def __init__(self, reducer=None, use_sent_edges=False,
                 name="edges_to_nodes_aggregator"):
        # reducer is fixed to unsorted segment-sum (the kernel); no learned params.
        self._use_sent_edges = use_sent_edges
        self._name = name

    def __call__(self, graph):
        # graph: dict with keys nodes, edges, senders, receivers, n_node
        for field in ("edges", "senders", "receivers"):
            if graph.get(field) is None:
                raise ValueError(
                    "`{}` field cannot be None when aggregating from edges.".format(field))
        if graph.get("nodes") is not None:
            num_nodes = graph["nodes"].shape[0]
        else:
            # Note: forces a concrete value (host sync); fine outside jit only.
            num_nodes = int(jnp.sum(graph["n_node"]))
        return edges_to_nodes_aggregate(
            graph["edges"], graph["senders"], graph["receivers"],
            num_nodes, use_sent_edges=self._use_sent_edges)


if __name__ == "__main__":
    key = jax.random.PRNGKey(0)
    k_e, k_s, k_r, k_n, k_e2, k_a2, k_b2 = jax.random.split(key, 7)

    # ---- small smoke test (single tile) ----------------------------------
    num_nodes, num_edges, edge_dim = 8, 16, 32
    edges = jax.random.normal(k_e, (num_edges, edge_dim), dtype=jnp.float32)
    senders = jax.random.randint(k_s, (num_edges,), 0, num_nodes, dtype=jnp.int32)
    receivers = jax.random.randint(k_r, (num_edges,), 0, num_nodes, dtype=jnp.int32)
    nodes = jax.random.normal(k_n, (num_nodes, edge_dim), dtype=jnp.float32)

    graph = {
        "nodes": nodes,
        "edges": edges,
        "senders": senders,
        "receivers": receivers,
        "n_node": jnp.array([num_nodes], dtype=jnp.int32),
    }

    agg = EdgesToNodesAggregator(use_sent_edges=False)
    out = jax.block_until_ready(agg(graph))
    ref = jax.ops.segment_sum(edges, receivers, num_segments=num_nodes)
    assert out.shape == (num_nodes, edge_dim)
    assert jnp.allclose(out, ref, atol=1e-5, rtol=1e-5)

    # sent-edges path
    agg_s = EdgesToNodesAggregator(use_sent_edges=True)
    out_s = jax.block_until_ready(agg_s(graph))
    ref_s = jax.ops.segment_sum(edges, senders, num_segments=num_nodes)
    assert jnp.allclose(out_s, ref_s, atol=1e-5, rtol=1e-5)

    # bf16 edges path (bf16 one-hot, f32 accumulation)
    edges_bf16 = edges.astype(jnp.bfloat16)
    out_bf = jax.block_until_ready(agg(dict(graph, edges=edges_bf16)))
    ref_bf = jax.ops.segment_sum(edges_bf16.astype(jnp.float32), receivers,
                                 num_segments=num_nodes)
    assert jnp.allclose(out_bf.astype(jnp.float32), ref_bf, atol=2e-2, rtol=2e-2)

    # ---- multi-tile test: exercises K-slicing, multi-node-tile accumulation,
    # and the block-sparse skip/fetch path (some (n,e) tile pairs are empty).
    n2, e2, d2 = 600, 1500, 64
    edges2 = jax.random.normal(k_e2, (e2, d2), dtype=jnp.float32)
    recv2 = jnp.concatenate([
        jax.random.randint(k_a2, (512,), 0, 50, dtype=jnp.int32),
        jax.random.randint(k_b2, (e2 - 512,), 550, 600, dtype=jnp.int32)])
    out2 = jax.block_until_ready(
        edges_to_nodes_aggregate(edges2, recv2, recv2, n2, use_sent_edges=False))
    ref2 = jax.ops.segment_sum(edges2, recv2, num_segments=n2)
    assert out2.shape == (n2, d2)
    assert jnp.allclose(out2, ref2, atol=1e-4, rtol=1e-4)

    print("KERNEL_OK")
</pallas_src>

<mosaic_0001>
module attributes {stable_mosaic.version = 11 : i64} {
  func.func @_segment_sum_kernel(%arg0: i32, %arg1: i32, %arg2: memref<1xi32, #tpu.memory_space<smem>>, %arg3: memref<1xi32, #tpu.memory_space<smem>>, %arg4: memref<1x128xi32, #tpu.memory_space<vmem>>, %arg5: memref<128x128xf32, #tpu.memory_space<vmem>>, %arg6: memref<8x128xf32, #tpu.memory_space<vmem>>, %arg7: memref<8x128xf32, #tpu.memory_space<vmem>>) attributes {dimension_semantics = [#tpu.dimension_semantics<parallel>, #tpu.dimension_semantics<arbitrary>], iteration_bounds = array<i64: 1, 1>, scalar_prefetch = 2 : i64, scratch_operands = 1 : i64, tpu.core_type = #tpu.core_type<tc>, window_params = [{transform_indices = @transform_0, window_bounds = array<i64: 1, 128>}, {transform_indices = @transform_1, window_bounds = array<i64: 128, 128>}, {transform_indices = @transform_2, window_bounds = array<i64: 8, 128>}]} {
    %c0_i32 = arith.constant 0 : i32
    %0 = arith.cmpi eq, %arg1, %c0_i32 : i32
    %1 = arith.extui %0 : i1 to i32
    %c0_i32_0 = arith.constant 0 : i32
    %2 = arith.cmpi ne, %1, %c0_i32_0 : i32
    scf.if %2 {
      %cst = arith.constant 0.000000e+00 : f32
      %13 = vector.broadcast %cst : f32 to vector<8x128xf32>
      %c0 = arith.constant 0 : index
      %c0_5 = arith.constant 0 : index
      %14 = vector.load %arg7[%c0, %c0_5] : memref<8x128xf32, #tpu.memory_space<vmem>>, vector<8x128xf32>
      tpu.vector_store %arg7[%c0, %c0_5], %13 {strides = array<i32>} : memref<8x128xf32, #tpu.memory_space<vmem>>, vector<8x128xf32>,
    } else {
    }
    %c1_i32 = arith.constant 1 : i32
    %3 = arith.muli %arg0, %c1_i32 : i32
    %4 = arith.addi %3, %arg1 : i32
    %5 = arith.index_cast %4 : i32 to index
    %6 = memref.load %arg2[%5] : memref<1xi32, #tpu.memory_space<smem>>
    %c0_i32_1 = arith.constant 0 : i32
    %7 = arith.cmpi sgt, %6, %c0_i32_1 : i32
    %8 = arith.extui %7 : i1 to i32
    %c0_i32_2 = arith.constant 0 : i32
    %9 = arith.cmpi ne, %8, %c0_i32_2 : i32
    scf.if %9 {
      %13 = tpu.iota {dimensions = array<i32: 0>} : vector<8x128xi32>
      %c8_i32 = arith.constant 8 : i32
      %14 = arith.muli %arg0, %c8_i32 : i32
      %c0 = arith.constant 0 : index
      %c0_5 = arith.constant 0 : index
      %15 = vector.load %arg7[%c0, %c0_5] : memref<8x128xf32, #tpu.memory_space<vmem>>, vector<8x128xf32>
      %c0_i32_6 = arith.constant 0 : i32
      %16 = tpu.assume_multiple %c0_i32_6, 128 : i32
      %c0_7 = arith.constant 0 : index
      %17 = arith.index_cast %16 : i32 to index
      %18 = vector.load %arg4[%c0_7, %17] : memref<1x128xi32, #tpu.memory_space<vmem>>, vector<1x128xi32>
      %19 = vector.broadcast %14 : i32 to vector<1x128xi32>
      %20 = arith.subi %18, %19 : vector<1x128xi32>
      %21 = vector.broadcast %20 : vector<1x128xi32> to vector<8x128xi32>
      %22 = arith.cmpi eq, %13, %21 : vector<8x128xi32>
      %23 = arith.extui %22 : vector<8x128xi1> to vector<8x128xi32>
      %24 = arith.sitofp %23 : vector<8x128xi32> to vector<8x128xf32>
      %25 = arith.index_cast %16 : i32 to index
      %c0_8 = arith.constant 0 : index
      %26 = vector.load %arg5[%25, %c0_8] : memref<128x128xf32, #tpu.memory_space<vmem>>, vector<128x128xf32>
      %cst = arith.constant dense<0.000000e+00> : vector<8x128xf32>
      %27 = tpu.matmul %24, %26, %cst {dimension_numbers = #tpu.dot_dimension_numbers<[1], [0], [0], [1], [0, 0, 1, 1], [], []>, precision = #tpu.contract_precision<fp32>} : vector<8x128xf32>, vector<128x128xf32>, vector<8x128xf32> -> vector<8x128xf32>
      %28 = arith.addf %15, %27 : vector<8x128xf32>
      %c0_9 = arith.constant 0 : index
      %c0_10 = arith.constant 0 : index
      %29 = vector.load %arg7[%c0_9, %c0_10] : memref<8x128xf32, #tpu.memory_space<vmem>>, vector<8x128xf32>
      tpu.vector_store %arg7[%c0_9, %c0_10], %28 {strides = array<i32>} : memref<8x128xf32, #tpu.memory_space<vmem>>, vector<8x128xf32>,
    } else {
    }
    %c0_i32_3 = arith.constant 0 : i32
    %10 = arith.cmpi eq, %arg1, %c0_i32_3 : i32
    %11 = arith.extui %10 : i1 to i32
    %c0_i32_4 = arith.constant 0 : i32
    %12 = arith.cmpi ne, %11, %c0_i32_4 : i32
    scf.if %12 {
      %c0 = arith.constant 0 : index
      %c0_5 = arith.constant 0 : index
      %13 = vector.load %arg7[%c0, %c0_5] : memref<8x128xf32, #tpu.memory_space<vmem>>, vector<8x128xf32>
      %c0_6 = arith.constant 0 : index
      %c0_7 = arith.constant 0 : index
      %14 = vector.load %arg6[%c0_6, %c0_7] : memref<8x128xf32, #tpu.memory_space<vmem>>, vector<8x128xf32>
      tpu.vector_store %arg6[%c0_6, %c0_7], %13 {strides = array<i32>} : memref<8x128xf32, #tpu.memory_space<vmem>>, vector<8x128xf32>,
    } else {
    }
    return
  }
  func.func @transform_0(%arg0: i32, %arg1: i32, %arg2: memref<1xi32, #tpu.memory_space<smem>>, %arg3: memref<1xi32, #tpu.memory_space<smem>>) -> (i32, i32) {
    %c1_i32 = arith.constant 1 : i32
    %0 = arith.muli %arg0, %c1_i32 : i32
    %1 = arith.addi %0, %arg1 : i32
    %2 = arith.index_cast %1 : i32 to index
    %3 = memref.load %arg3[%2] : memref<1xi32, #tpu.memory_space<smem>>
    %c0_i32 = arith.constant 0 : i32
    %c0_i32_0 = arith.constant 0 : i32
    return %c0_i32, %3 : i32, i32
  }
  func.func @transform_1(%arg0: i32, %arg1: i32, %arg2: memref<1xi32, #tpu.memory_space<smem>>, %arg3: memref<1xi32, #tpu.memory_space<smem>>) -> (i32, i32) {
    %c1_i32 = arith.constant 1 : i32
    %0 = arith.muli %arg0, %c1_i32 : i32
    %1 = arith.addi %0, %arg1 : i32
    %2 = arith.index_cast %1 : i32 to index
    %3 = memref.load %arg3[%2] : memref<1xi32, #tpu.memory_space<smem>>
    %c0_i32 = arith.constant 0 : i32
    %c0_i32_0 = arith.constant 0 : i32
    return %3, %c0_i32 : i32, i32
  }
  func.func @transform_2(%arg0: i32, %arg1: i32, %arg2: memref<1xi32, #tpu.memory_space<smem>>, %arg3: memref<1xi32, #tpu.memory_space<smem>>) -> (i32, i32) {
    %c0_i32 = arith.constant 0 : i32
    %c0_i32_0 = arith.constant 0 : i32
    return %arg0, %c0_i32 : i32, i32
  }
}

</mosaic_0001>

<bundles_post_ra>
// kernel: tpu_custom_call.1
= control target key start
LH: loop header
LB: loop body
LE: loop exit
PB: predicated region body
PF: predicated region fallthrough
CT: control target
= control target key end

     0   :  { %11 = vsyncpa [#allocation7], 0  ;;  %s1644_s0 = inlined_call_operand.<no memory space> [shape: s32[1], index: 0, kind: input, shape index: {}]   ;;  %s1645_s1 = inlined_call_operand.<no memory space> [shape: s32[1], index: 1, kind: input, shape index: {}]   ;;  %s1646_s2 = inlined_call_operand.vmem [shape: s32[1,128], index: 2, kind: input, shape index: {}]   ;;  %s1647_s3 = inlined_call_operand.hbm [shape: f32[128,128], index: 3, kind: input, shape index: {}]   ;;  %s1648_s4 = inlined_call_operand.hbm [shape: f32[8,128], index: 4, kind: output, shape index: {}]  }
   0x1   :  { %12 = vsyncpa [#allocation8], 0  ;;  %s774_s17 = sshll.u32 %s1645_s1, 11  ;;  %s1290_s21 = smov [#allocation6]  }
   0x2   :  { %s31_s20 = scalar_lea.hbm %s1647_s3, %s774_s17  ;;  %s32_s22 = sshll.u32 %s1290_s21, 4  ;;  %s33_s22 = int_to_ptr.vmem [resolvable:$true] %s32_s22 }
   0x3   :  { %s1240_s23 = scalar_lea.hbm %s31_s20, 2048  ;;  %s1242_s26 = scalar_lea.hbm %s1647_s3, 2048 }
   0x4   :  { %p1241_p0 = scmp.ne.s32.totalorder %s31_s20, %s1240_s23  ;;  %p1243_p1 = scmp.lt.u32.totalorder %s31_s20, %s1647_s3 }
   0x5   :  { %p1244_p2 = scmp.lt.u32.totalorder %s1242_s26, %s1240_s23  ;;  %p1246_p4 = scmp.lt.u32.totalorder %s1240_s23, %s31_s20 }
   0x7   :  { %p1245_p3 = por %p1244_p2, %p1243_p1 }
   0x9   :  { %p1247_p5 = por %p1246_p4, %p1245_p3 }
   0xb   :  { %p1248_p6 = pnand %p1247_p5, %p1241_p0 }
   0xd   :  { %1251 = shalt.err (!%p1248_p6)
}
   0xe   :  { %s1252_s29 = scalar_lea.vmem %s33_s22, 2048  ;;  %p1257_p8 = scmp.lt.s32.totalorder %s33_s22, %s33_s22 }
   0xf   :  { %p1253_p7 = scmp.ne.s32.totalorder %s33_s22, %s1252_s29  ;;  %p1258_p9 = scmp.lt.s32.totalorder %s1252_s29, %s1252_s29 }
  0x11   :  { %p1259_p10 = por %p1258_p9, %p1257_p8 }
  0x13   :  { %p1260_p11 = pnand %p1259_p10, %p1253_p7 }
  0x15   :  { %1263 = shalt.err (!%p1260_p11)
}
  0x16   :  { %s1291_s30 = smov 128   ;;  %s1292_s5 = smov 8  }
  0x17   :  { %38 = dma.hbm_to_vmem [thread:$0]  %s31_s20, 2048, %s33_s22, [#allocation7], %s1291_s30, %s1291_s30, %s1292_s5  }
  0x18   :  { %1286 = dma.done.wait [#allocation7], 2048  }
  0x19   :  { %1287 = vsyncadd [#allocation7], 4294965248  ;;  %p49_p12 = scmp.lt.s32.totalorder %s1645_s1, 0  ;;  %v1293_v0 = vmov 0.0   ;;  %p768_p13 = scmp.le.s32.totalorder %s1644_s0, 0 }
  0x1a   :  { %61 = vst [vmem:[#allocation2] sm:$0xff] %v1293_v0  ;;  %v82_v1 = vld [vmem:[#allocation6] sm:$0xff] (!%p768_p13)  ;;  %v83_v2 = vld [vmem:[#allocation6 + $0x8] sm:$0xff] (!%p768_p13)  ;;  %v84_v3 = vld [vmem:[#allocation6 + $0x10] sm:$0xff] (!%p768_p13)  ;;  %v1294_v4 = vmov (!%p768_p13), 0.0|0.0   ;;  %vm1295_vm0 = vmmov (!%p768_p13), 0   ;;  %v68_v24 = vlaneseq (!%p768_p13) }
  0x1b   :  { %s1650_s1 = smov (!%p49_p12, %s1645_s1), 0  ;;  %67 = sbr.rel (%p768_p13) target bundleno = 352 (0x160), region = 21 }
  0x1c   :  { %s51_s11 = scalar_lea.vmem %s1646_s2, %s1650_s1  ;;  %1087 = vmatprep.subr.bf16.mxu0 (!%p768_p13), %v1294_v4  ;;  %v99_v5 = vand.u32 (!%p768_p13), 4294901760, %v82_v1  ;;  %v102_v6 = vand.u32 (!%p768_p13), 4294901760, %v83_v2  ;;  %v85_v7 = vld [vmem:[#allocation6 + $0x18] sm:$0xff] (!%p768_p13)  ;;  %v105_v8 = vand.u32 (!%p768_p13), 4294901760, %v84_v3  ;;  %1111 = vmatprep.subr.bf16.mxu1 (!%p768_p13), %v1294_v4  ;;  %v86_v9 = vld [vmem:[#allocation6 + $0x20] sm:$0xff] (!%p768_p13)  ;;  %v87_v10 = vld [vmem:[#allocation6 + $0x28] sm:$0xff] (!%p768_p13) }
  0x1d   :  { %v108_v11 = vand.u32 (!%p768_p13), 4294901760, %v85_v7  ;;  %v111_v12 = vand.u32 (!%p768_p13), 4294901760, %v86_v9  ;;  %v114_v13 = vand.u32 (!%p768_p13), 4294901760, %v87_v10  ;;  %v88_v14 = vld [vmem:[#allocation6 + $0x30] sm:$0xff] (!%p768_p13)  ;;  %v1296_v15 = vmov (!%p768_p13), 0.0   ;;  %v89_v20 = vld [vmem:[#allocation6 + $0x38] sm:$0xff] (!%p768_p13) }
  0x1e   :  { %909 = vmatprep.mubr.msk.f32.mxu0 (!%p768_p13), %vm1295_vm0, %v1296_v15  ;;  %944 = vmatprep.mubr.msk.f32.mxu1 (!%p768_p13), %vm1295_vm0, %v1296_v15  ;;  %v1357_v16 = vpack.c.bf16 (!%p768_p13), %v102_v6, %v99_v5  ;;  %v1359_v17 = vsub.f32 (!%p768_p13), %v82_v1, %v99_v5  ;;  %v1361_v18 = vsub.f32 (!%p768_p13), %v83_v2, %v102_v6  ;;  %v90_v21 = vld [vmem:[#allocation6 + $0x40] sm:$0xff] (!%p768_p13)  ;;  %v117_v28 = vand.u32 (!%p768_p13), 4294901760, %v88_v14  ;;  %v91_v29 = vld [vmem:[#allocation6 + $0x48] sm:$0xff] (!%p768_p13)  ;;  %v92_v42 = vld [vmem:[#allocation6 + $0x50] sm:$0xff] (!%p768_p13) }
  0x1f   :  { %v1363_v19 = vsub.f32 (!%p768_p13), %v84_v3, %v105_v8  ;;  %v1365_v22 = vpack.c.bf16 (!%p768_p13), %v108_v11, %v105_v8  ;;  %v1367_v23 = vsub.f32 (!%p768_p13), %v85_v7, %v108_v11  ;;  %v1370_v25 = vsub.f32 (!%p768_p13), %v86_v9, %v111_v12  ;;  %v93_v43 = vld [vmem:[#allocation6 + $0x58] sm:$0xff] (!%p768_p13)  ;;  %v94_v52 = vld [vmem:[#allocation6 + $0x60] sm:$0xff] (!%p768_p13)  ;;  %v95_v61 = vld [vmem:[#allocation6 + $0x68] sm:$0xff] (!%p768_p13) }
  0x20   :  { %1089 = vmatpush3.bf16.msra.mxu0 (!%p768_p13), %v1357_v16  ;;  %v192_v26 = vand.u32 (!%p768_p13), 4294901760, %v1359_v17  ;;  %v199_v27 = vand.u32 (!%p768_p13), 4294901760, %v1361_v18  ;;  %v120_v30 = vand.u32 (!%p768_p13), 4294901760, %v89_v20  ;;  %v123_v33 = vand.u32 (!%p768_p13), 4294901760, %v90_v21  ;;  %v96_v2 = vld [vmem:[#allocation6 + $0x70] sm:$0xff] (!%p768_p13)  ;;  %v97_v8 = vld [vmem:[#allocation6 + $0x78] sm:$0xff] (!%p768_p13) }
  0x21   :  { %1090 = vmatprep.subr.bf16.mxu0 (!%p768_p13), %v1294_v4  ;;  %v206_v31 = vand.u32 (!%p768_p13), 4294901760, %v1363_v19  ;;  %v213_v32 = vand.u32 (!%p768_p13), 4294901760, %v1367_v23  ;;  %v1377_v34 = vsub.f32 (!%p768_p13), %v87_v10, %v114_v13  ;;  %v1385_v37 = vsub.f32 (!%p768_p13), %v88_v14, %v117_v28 }
  0x22   :  { %v193_v35 = vsub.f32 %v1359_v17, %v192_v26  ;;  %v200_v36 = vsub.f32 %v1361_v18, %v199_v27  ;;  %v1387_v38 = vsub.f32 %v89_v20, %v120_v30  ;;  %v126_v41 = vand.u32 4294901760, %v91_v29 }
  0x23   :  { %v207_v39 = vsub.f32 %v1363_v19, %v206_v31  ;;  %v214_v40 = vsub.f32 %v1367_v23, %v213_v32  ;;  %v1396_v44 = vpack.c.bf16 %v114_v13, %v111_v12  ;;  %v1398_v47 = vpack.c.bf16 %v120_v30, %v117_v28 }
  0x24   :  { %1092 = vmatpush3.bf16.msra.mxu0 %v1365_v22  ;;  %v194_v45 = vand.u32 4294901760, %v193_v35  ;;  %v201_v46 = vand.u32 4294901760, %v200_v36  ;;  %v1401_v50 = vsub.f32 %v90_v21, %v123_v33  ;;  %v220_v51 = vand.u32 4294901760, %v1370_v25 }
  0x25   :  { %1093 = vmatprep.subr.bf16.mxu0 %v1294_v4  ;;  %v208_v48 = vand.u32 4294901760, %v207_v39  ;;  %v215_v49 = vand.u32 4294901760, %v214_v40  ;;  %v227_v54 = vand.u32 4294901760, %v1377_v34  ;;  %v129_v55 = vand.u32 4294901760, %v92_v42 }
  0x26   :  { %v1112_v53 = vpack.c.bf16 %v201_v46, %v194_v45  ;;  %v132_v56 = vand.u32 4294901760, %v93_v43  ;;  %v1405_v57 = vsub.f32 %v91_v29, %v126_v41  ;;  %v221_v58 = vsub.f32 %v1370_v25, %v220_v51  ;;  %v1456_v45 = vld [vmem:[%s51_s11] ss:$0 sm:$0xff] }
  0x27   :  { %v234_v59 = vand.u32 4294901760, %v1385_v37  ;;  %v241_v60 = vand.u32 4294901760, %v1387_v38  ;;  %v1115_v62 = vpack.c.bf16 %v215_v49, %v208_v48  ;;  %v1413_v63 = vpack.c.bf16 %v126_v41, %v123_v33 }
  0x28   :  { %1095 = vmatpush3.bf16.msra.mxu0 %v1396_v44  ;;  %1113 = vmatpush3.bf16.msra.mxu1 %v1112_v53  ;;  %v228_v0 = vsub.f32 %v1377_v34, %v227_v54  ;;  %v135_v1 = vand.u32 4294901760, %v94_v52  ;;  %v222_v3 = vand.u32 4294901760, %v221_v58  ;;  %v1420_v5 = vsub.f32 %v92_v42, %v129_v55 }
  0x29   :  { %1096 = vmatprep.subr.bf16.mxu0 %v1294_v4  ;;  %1114 = vmatprep.subr.bf16.mxu1 %v1294_v4  ;;  %v235_v6 = vsub.f32 %v1385_v37, %v234_v59  ;;  %v242_v7 = vsub.f32 %v1387_v38, %v241_v60  ;;  %v1428_v10 = vsub.f32 %v93_v43, %v132_v56  ;;  %v138_v11 = vand.u32 4294901760, %v95_v61 }
  0x2a   :  { %v229_v9 = vand.u32 4294901760, %v228_v0  ;;  %v248_v12 = vand.u32 4294901760, %v1401_v50  ;;  %v255_v20 = vand.u32 4294901760, %v1405_v57  ;;  %v141_v21 = vand.u32 4294901760, %v96_v2 }
  0x2b   :  { %v236_v13 = vand.u32 4294901760, %v235_v6  ;;  %v243_v14 = vand.u32 4294901760, %v242_v7  ;;  %v1433_v29 = vsub.f32 %v94_v52, %v135_v1  ;;  %v1435_v30 = vsub.f32 %v95_v61, %v138_v11 }
  0x2c   :  { %1098 = vmatpush3.bf16.msra.mxu0 %v1398_v47  ;;  %1116 = vmatpush3.bf16.msra.mxu1 %v1115_v62  ;;  %v1118_v28 = vpack.c.bf16 %v229_v9, %v222_v3  ;;  %v144_v33 = vand.u32 4294901760, %v97_v8  ;;  %v249_v35 = vsub.f32 %v1401_v50, %v248_v12  ;;  %v256_v36 = vsub.f32 %v1405_v57, %v255_v20 }
  0x2d   :  { %1099 = vmatprep.subr.bf16.mxu0 %v1294_v4  ;;  %1117 = vmatprep.subr.bf16.mxu1 %v1294_v4  ;;  %v262_v39 = vand.u32 4294901760, %v1420_v5  ;;  %v1446_v40 = vpack.c.bf16 %v132_v56, %v129_v55  ;;  %v1121_v41 = vpack.c.bf16 %v243_v14, %v236_v13  ;;  %v1448_v42 = vsub.f32 %v96_v2, %v141_v21 }
  0x2e   :  { %v269_v43 = vand.u32 4294901760, %v1428_v10  ;;  %v250_v46 = vand.u32 4294901760, %v249_v35  ;;  %v257_v48 = vand.u32 4294901760, %v256_v36  ;;  %v1462_v52 = vshrl.u32 %v68_v24, 7 }
  0x2f   :  { %v263_v49 = vsub.f32 %v1420_v5, %v262_v39  ;;  %v1465_v53 = vsub.f32 %v97_v8, %v144_v33  ;;  %v276_v56 = vand.u32 4294901760, %v1433_v29  ;;  %v283_v58 = vand.u32 4294901760, %v1435_v30 }
  0x30   :  { %1101 = vmatpush3.bf16.msra.mxu0 %v1413_v63  ;;  %1119 = vmatpush3.bf16.msra.mxu1 %v1118_v28  ;;  %v270_v55 = vsub.f32 %v1428_v10, %v269_v43  ;;  %vm79_vm1 = vcmp.eq.s32.totalorder %v1462_v52, %v1456_v45  ;;  %v1476_v24 = vpack.c.bf16 %v138_v11, %v135_v1  ;;  %v290_v3 = vand.u32 4294901760, %v1448_v42 }
  0x31   :  { %1102 = vmatprep.subr.bf16.mxu0 %v1294_v4  ;;  %1120 = vmatprep.subr.bf16.mxu1 %v1294_v4  ;;  %v770_v61 = vsel %vm79_vm1, 1.0, %v1296_v15  ;;  %v1124_v62 = vpack.c.bf16 %v257_v48, %v250_v46  ;;  %v264_v0 = vand.u32 4294901760, %v263_v49  ;;  %v277_v1 = vsub.f32 %v1433_v29, %v276_v56 }
  0x32   :  { %v1482_v2 = vsub.f32 %v770_v61, %v770_v61  ;;  %v271_v6 = vand.u32 4294901760, %v270_v55  ;;  %v284_v7 = vsub.f32 %v1435_v30, %v283_v58  ;;  %v297_v8 = vand.u32 4294901760, %v1465_v53 }
  0x33   :  { %v1496_v11 = vpack.c.bf16 %v144_v33, %v141_v21  ;;  %v291_v14 = vsub.f32 %v1448_v42, %v290_v3  ;;  %v278_v35 = vand.u32 4294901760, %v277_v1  ;;  %v1136_v46 = vpack.c.bf16 %v1361_v18, %v1359_v17 }
  0x34   :  { %1104 = vmatpush3.bf16.msra.mxu0 %v1446_v40  ;;  %1122 = vmatpush3.bf16.msra.mxu1 %v1121_v41  ;;  %v181_v9 = vand.u32 4294901760, %v1482_v2  ;;  %v1127_v28 = vpack.c.bf16 %v271_v6, %v264_v0  ;;  %v285_v36 = vand.u32 4294901760, %v284_v7  ;;  %v298_v41 = vsub.f32 %v1465_v53, %v297_v8 }
  0x35   :  { %1105 = vmatprep.subr.bf16.mxu0 %v1294_v4  ;;  %1123 = vmatprep.subr.bf16.mxu1 %v1294_v4  ;;  %v292_v48 = vand.u32 4294901760, %v291_v14  ;;  %v1139_v61 = vpack.c.bf16 %v1367_v23, %v1363_v19  ;;  %v1297_v0 = vmov 1.0   ;;  %v1145_v6 = vpack.c.bf16 %v1387_v38, %v1385_v37 }
  0x36   :  { %v182_v13 = vsub.f32 %v1482_v2, %v181_v9  ;;  %v1130_v33 = vpack.c.bf16 %v285_v36, %v278_v35  ;;  %v299_v49 = vand.u32 4294901760, %v298_v41  ;;  %v1148_v1 = vpack.c.bf16 %v1405_v57, %v1401_v50 }
  0x37   :  { %v1151_v7 = vpack.c.bf16 %v1428_v10, %v1420_v5  ;;  %v1157_v14 = vpack.c.bf16 %v1465_v53, %v1448_v42  ;;  %v1187_v35 = vpack.c.bf16 %v213_v32, %v206_v31  ;;  %v1190_v17 = vpack.c.bf16 %v227_v54, %v220_v51  ;;  %v71_v54 = vld [vmem:[#allocation2] sm:$0xff] }
  0x38   :  { %1107 = vmatpush3.bf16.msra.mxu0 %v1476_v24  ;;  %1125 = vmatpush3.bf16.msra.mxu1 %v1124_v62  ;;  %v183_v21 = vand.u32 4294901760, %v182_v13  ;;  %v1133_v55 = vpack.c.bf16 %v299_v49, %v292_v48  ;;  %v1142_v62 = vpack.c.bf16 %v1377_v34, %v1370_v25  ;;  %v1154_v13 = vpack.c.bf16 %v1435_v30, %v1433_v29 }
  0x39   :  { %1108 = vmatprep.subr.bf16.mxu0 %v1294_v4  ;;  %1126 = vmatprep.subr.bf16.mxu1 %v1294_v4  ;;  %v1193_v18 = vpack.c.bf16 %v241_v60, %v234_v59  ;;  %v1202_v19 = vpack.c.bf16 %v283_v58, %v276_v56 }
  0x3c   :  { %1110 = vmatpush3.bf16.msra.mxu0 %v1496_v11  ;;  %1128 = vmatpush3.bf16.msra.mxu1 %v1127_v28  ;;  %v1184_v28 = vpack.c.bf16 %v199_v27, %v192_v26 }
  0x3d   :  { %1129 = vmatprep.subr.bf16.mxu1 %v1294_v4  ;;  %1135 = vmatprep.subr.bf16.mxu0 %v1294_v4 }
  0x3f   :  { %910 = vmatmul.mubr.f32.vlgmr.msra.gmra.mrb[0].mxu0 %v183_v21 }
  0x40   :  { %1131 = vmatpush3.bf16.msra.mxu1 %v1130_v33  ;;  %1137 = vmatpush3.bf16.msra.mxu0 %v1136_v46 }
  0x41   :  { %1132 = vmatprep.subr.bf16.mxu1 %v1294_v4  ;;  %1138 = vmatprep.subr.bf16.mxu0 %v1294_v4 }
  0x42   :  { %979 = vmatprep.mubr.msk.f32.mxu0 %vm1295_vm0, %v1296_v15 }
  0x44   :  { %1134 = vmatpush3.bf16.msra.mxu1 %v1133_v55  ;;  %1140 = vmatpush3.bf16.msra.mxu0 %v1139_v61 }
  0x45   :  { %1141 = vmatprep.subr.bf16.mxu0 %v1294_v4  ;;  %1159 = vmatprep.subr.bf16.mxu1 %v1294_v4 }
  0x47   :  { %945 = vmatmul.mubr.msk.f32.vlgmr.msra.gmra.mrb[0].mxu1 %vm79_vm1, %v1297_v0 }
  0x48   :  { %1143 = vmatpush3.bf16.msra.mxu0 %v1142_v62  ;;  %1161 = vmatpush3.bf16.msra.mxu1 %v1357_v16 }
  0x49   :  { %1144 = vmatprep.subr.bf16.mxu0 %v1294_v4  ;;  %1162 = vmatprep.subr.bf16.mxu1 %v1294_v4 }
  0x4a   :  { %1014 = vmatprep.mubr.msk.f32.mxu1 %vm1295_vm0, %v1296_v15 }
  0x4c   :  { %1146 = vmatpush3.bf16.msra.mxu0 %v1145_v6  ;;  %1164 = vmatpush3.bf16.msra.mxu1 %v1365_v22 }
  0x4d   :  { %1147 = vmatprep.subr.bf16.mxu0 %v1294_v4  ;;  %1165 = vmatprep.subr.bf16.mxu1 %v1294_v4 }
  0x50   :  { %1149 = vmatpush3.bf16.msra.mxu0 %v1148_v1  ;;  %1167 = vmatpush3.bf16.msra.mxu1 %v1396_v44 }
  0x51   :  { %1150 = vmatprep.subr.bf16.mxu0 %v1294_v4  ;;  %1168 = vmatprep.subr.bf16.mxu1 %v1294_v4 }
  0x54   :  { %1152 = vmatpush3.bf16.msra.mxu0 %v1151_v7  ;;  %1170 = vmatpush3.bf16.msra.mxu1 %v1398_v47 }
  0x55   :  { %1153 = vmatprep.subr.bf16.mxu0 %v1294_v4  ;;  %1171 = vmatprep.subr.bf16.mxu1 %v1294_v4 }
  0x58   :  { %1155 = vmatpush3.bf16.msra.mxu0 %v1154_v13  ;;  %1173 = vmatpush3.bf16.msra.mxu1 %v1413_v63 }
  0x59   :  { %1156 = vmatprep.subr.bf16.mxu0 %v1294_v4  ;;  %1174 = vmatprep.subr.bf16.mxu1 %v1294_v4 }
  0x5c   :  { %1158 = vmatpush3.bf16.msra.mxu0 %v1157_v14  ;;  %1176 = vmatpush3.bf16.msra.mxu1 %v1446_v40 }
  0x5d   :  { %1177 = vmatprep.subr.bf16.mxu1 %v1294_v4  ;;  %1183 = vmatprep.subr.bf16.mxu0 %v1294_v4 }
  0x5f   :  { %980 = vmatmul.mubr.f32.vlgmr.msra.gmra.mrb[2].mxu0 %v1482_v2 }
  0x60   :  { %1179 = vmatpush3.bf16.msra.mxu1 %v1476_v24  ;;  %1185 = vmatpush3.bf16.msra.mxu0 %v1184_v28 }
  0x61   :  { %1180 = vmatprep.subr.bf16.mxu1 %v1294_v4  ;;  %1186 = vmatprep.subr.bf16.mxu0 %v1294_v4 }
  0x62   :  { %1049 = vmatprep.mubr.msk.f32.mxu0 %vm1295_vm0, %v1296_v15 }
  0x64   :  { %1182 = vmatpush3.bf16.msra.mxu1 %v1496_v11  ;;  %1188 = vmatpush3.bf16.msra.mxu0 %v1187_v35 }
  0x65   :  { %1189 = vmatprep.subr.bf16.mxu0 %v1294_v4  ;;  %1207 = vmatprep.subr.bf16.mxu1 %v1294_v4 }
  0x67   :  { %1015 = vmatmul.mubr.f32.vlgmr.msra.gmra.mrb[2].mxu1 %v181_v9 }
  0x68   :  { %1191 = vmatpush3.bf16.msra.mxu0 %v1190_v17  ;;  %1209 = vmatpush3.bf16.msra.mxu1 %v1357_v16  ;;  %v1196_v16 = vpack.c.bf16 %v255_v20, %v248_v12 }
  0x69   :  { %1192 = vmatprep.subr.bf16.mxu0 %v1294_v4  ;;  %1210 = vmatprep.subr.bf16.mxu1 %v1294_v4 }
  0x6a   :  { %1084 = vmatprep.mubr.msk.f32.mxu1 %vm1295_vm0, %v1296_v15  ;;  %v1199_v15 = vpack.c.bf16 %v269_v43, %v262_v39 }
  0x6c   :  { %1194 = vmatpush3.bf16.msra.mxu0 %v1193_v18  ;;  %1212 = vmatpush3.bf16.msra.mxu1 %v1365_v22  ;;  %v1205_v22 = vpack.c.bf16 %v297_v8, %v290_v3 }
  0x6d   :  { %1195 = vmatprep.subr.bf16.mxu0 %v1294_v4  ;;  %1213 = vmatprep.subr.bf16.mxu1 %v1294_v4 }
  0x70   :  { %1197 = vmatpush3.bf16.msra.mxu0 %v1196_v16  ;;  %1215 = vmatpush3.bf16.msra.mxu1 %v1396_v44 }
  0x71   :  { %1198 = vmatprep.subr.bf16.mxu0 %v1294_v4  ;;  %1216 = vmatprep.subr.bf16.mxu1 %v1294_v4 }
  0x74   :  { %1200 = vmatpush3.bf16.msra.mxu0 %v1199_v15  ;;  %1218 = vmatpush3.bf16.msra.mxu1 %v1398_v47 }
  0x75   :  { %1201 = vmatprep.subr.bf16.mxu0 %v1294_v4  ;;  %1219 = vmatprep.subr.bf16.mxu1 %v1294_v4 }
  0x78   :  { %1203 = vmatpush3.bf16.msra.mxu0 %v1202_v19  ;;  %1221 = vmatpush3.bf16.msra.mxu1 %v1413_v63 }
  0x79   :  { %1204 = vmatprep.subr.bf16.mxu0 %v1294_v4  ;;  %1222 = vmatprep.subr.bf16.mxu1 %v1294_v4 }
  0x7c   :  { %1206 = vmatpush3.bf16.msra.mxu0 %v1205_v22  ;;  %1224 = vmatpush3.bf16.msra.mxu1 %v1446_v40 }
  0x7d   :  { %1225 = vmatprep.subr.bf16.mxu1 %v1294_v4 }
  0x7f   :  { %1050 = vmatmul.mubr.msk.f32.vlgmr.msra.gmra.mrb[4].mxu0 %vm79_vm1, %v1297_v0 }
  0x80   :  { %1227 = vmatpush3.bf16.msra.mxu1 %v1476_v24 }
  0x81   :  { %1228 = vmatprep.subr.bf16.mxu1 %v1294_v4 }
  0x84   :  { %1230 = vmatpush3.bf16.msra.mxu1 %v1496_v11 }
  0x87   :  { %1085 = vmatmul.mubr.msk.f32.vlgmr.msra.gmra.mrb[4].mxu1 %vm79_vm1, %v1297_v0 }
 0x112   :  { %v185_v23 = vpop.f32.mrb[0].mxu0 }
 0x113   :  { %v911_v25 = vpop.f32.mrb[1].mxu0 }
 0x11a   :  { %v336_v26 = vpop.f32.mrb[0].mxu1 }
 0x11b   :  { %v337_v27 = vadd.f32 %v336_v26, %v185_v23  ;;  %v946_v31 = vpop.f32.mrb[1].mxu1 }
 0x132   :  { %v440_v32 = vpop.f32.mrb[2].mxu0 }
 0x133   :  { %v441_v34 = vadd.f32 %v440_v32, %v337_v27  ;;  %v981_v37 = vpop.f32.mrb[3].mxu0 }
 0x13a   :  { %v529_v38 = vpop.f32.mrb[2].mxu1 }
 0x13b   :  { %v530_v44 = vadd.f32 %v529_v38, %v441_v34  ;;  %v1016_v47 = vpop.f32.mrb[3].mxu1 }
 0x152   :  { %v648_v50 = vpop.f32.mrb[4].mxu0 }
 0x153   :  { %v649_v4 = vadd.f32 %v648_v50, %v530_v44  ;;  %v1051_v51 = vpop.f32.mrb[5].mxu0 }
 0x15a   :  { %v735_v57 = vpop.f32.mrb[4].mxu1 }
 0x15b   :  { %v736_v59 = vadd.f32 %v735_v57, %v649_v4  ;;  %v1086_v60 = vpop.f32.mrb[5].mxu1 }
 0x15d   :  { %v739_v63 = vadd.f32 %v736_v59, %v71_v54 }
 0x15f   :  { %740 = vst [vmem:[#allocation2] sm:$0xff] %v739_v63 }
 0x160 PF:  { %s1298_s1 = smov [#allocation9]  }
 0x161   :  { %s752_s2 = sshll.u32 %s1298_s1, 4  ;;  %s753_s2 = int_to_ptr.vmem [resolvable:$true] %s752_s2 }
 0x162   :  { %s1264_s15 = scalar_lea.vmem %s753_s2, 128  ;;  %p1269_p1 = scmp.lt.s32.totalorder %s753_s2, %s753_s2 }
 0x163   :  { %p1265_p0 = scmp.ne.s32.totalorder %s753_s2, %s1264_s15  ;;  %p1270_p2 = scmp.lt.s32.totalorder %s1264_s15, %s1264_s15 }
 0x165   :  { %p1271_p3 = por %p1270_p2, %p1269_p1 }
 0x166   :  { %v744_v5 = vld [vmem:[#allocation2] sm:$0xff] }
 0x167   :  { %745 = vst [vmem:[#allocation9] sm:$0xff] %v744_v5  ;;  %p1272_p4 = pnand %p1271_p3, %p1265_p0 }
 0x169   :  { %1275 = shalt.err (!%p1272_p4)
}
 0x16a   :  { %s1276_s18 = scalar_lea.hbm %s1648_s4, 128 }
 0x16b   :  { %p1277_p5 = scmp.ne.s32.totalorder %s1648_s4, %s1276_s18  ;;  %p1280_p6 = scmp.lt.u32.totalorder %s1276_s18, %s1648_s4 }
 0x16d   :  { %p1282_p7 = pnand %p1280_p6, %p1277_p5 }
 0x16f   :  { %1285 = shalt.err (!%p1282_p7)
}
 0x170   :  { %755 = dma.vmem_to_hbm [thread:$0]  %s753_s2, 128, %s1648_s4, [#allocation8]  }
 0x171   :  { %1288 = dma.done.wait [#allocation8], 128  }
 0x172   :  { %1289 = vsyncadd [#allocation8], 4294967168 }
 0x173   :  { %759 = vsyncpa [#allocation7], 1 }
 0x174   :  { %760 = vsyncpa [#allocation8], 1 }

</bundles_post_ra>
